<compile_context>
chip_gen: v7x
topology: tpu7x:2x2x1
jax: 0.10.0
libtpu: 0.0.40
codegen_flags: <defaults>
</compile_context>

<pallas_src>
import jax
import jax.numpy as jnp
from jax import lax
from jax.experimental import pallas as pl
from jax.experimental.pallas import tpu as pltpu


def _layernorm(h, gamma, beta, eps=1e-5):
    # PyTorch nn.LayerNorm semantics: biased variance, eps inside rsqrt.
    mu = jnp.mean(h, axis=-1, keepdims=True)
    var = jnp.mean((h - mu) ** 2, axis=-1, keepdims=True)
    return (h - mu) * lax.rsqrt(var + eps) * gamma + beta


def ae_rtm_encoder_kernel(
    x_ref,
    w1_ref, b1_ref, g1_ref, be1_ref,
    w2_ref, b2_ref, g2_ref, be2_ref,
    w3_ref, b3_ref, g3_ref, be3_ref,
    w4_ref, b4_ref,
    out_ref,
):
    H = w4_ref.shape[1]
    x = x_ref[...]  # bf16 tile (TB, input_dim)

    # Linear(input_dim, 64) -> LayerNorm(64) -> ReLU   (bf16 MXU, f32 accum)
    h = jnp.dot(x, w1_ref[...], preferred_element_type=jnp.float32) + b1_ref[...]
    h = jnp.maximum(_layernorm(h, g1_ref[...], be1_ref[...]), 0.0)

    # Linear(64, 32) -> LayerNorm(32) -> ReLU
    h = jnp.dot(h.astype(jnp.bfloat16), w2_ref[...],
                preferred_element_type=jnp.float32) + b2_ref[...]
    h = jnp.maximum(_layernorm(h, g2_ref[...], be2_ref[...]), 0.0)

    # Linear(32, 16) -> LayerNorm(16) -> ReLU
    h = jnp.dot(h.astype(jnp.bfloat16), w3_ref[...],
                preferred_element_type=jnp.float32) + b3_ref[...]
    h = jnp.maximum(_layernorm(h, g3_ref[...], be3_ref[...]), 0.0)

    # Linear(16, hidden_dim)
    enc = jnp.dot(h.astype(jnp.bfloat16), w4_ref[...],
                  preferred_element_type=jnp.float32) + b4_ref[...]
    enc = enc.astype(out_ref.dtype)

    # Packed output slab: [:, :H] = encoded, [:, H:] = para_tensor
    out_ref[:, :H] = enc
    out_ref[:, H:] = enc
    # para_tensor[:, 5] = para_tensor[:, 2] - para_tensor[:, 4]  (clone-then-assign)
    out_ref[:, H + 5:H + 6] = (enc[:, 2:3] - enc[:, 4:5]).astype(out_ref.dtype)


def ae_rtm_forward(x, params, *, tile_b=256):
    """AE_RTM encoder + RTM-parameter adjustment in one Pallas call.

    Returns (encoded, para_tensor) — para_tensor columns correspond (in order)
    to the RTM parameters: cab, cw, cm, LAI, cp, cbc, car, anth.
    """
    B, input_dim = x.shape
    H = params["w4"].shape[1]

    # Batch tile: whole batch when small, otherwise a multiple-of-32 tile.
    # VMEM per step is tiny (tile_b*(input_dim*2 + 2*H*4)*2 buffers + ~60 KiB of
    # weights) — far under the 32 MiB default scoped limit on all generations.
    TB = B if B <= tile_b else tile_b
    grid = (pl.cdiv(B, TB),)

    # bf16 on the x / weight DMA + MXU path (halves input HBM bytes).
    x_bf = x.astype(jnp.bfloat16)
    ordered = [
        params["w1"].astype(jnp.bfloat16), params["b1"], params["g1"], params["be1"],
        params["w2"].astype(jnp.bfloat16), params["b2"], params["g2"], params["be2"],
        params["w3"].astype(jnp.bfloat16), params["b3"], params["g3"], params["be3"],
        params["w4"].astype(jnp.bfloat16), params["b4"],
    ]

    def resident(a):
        nd = a.ndim
        # Constant block index => stays resident in VMEM across grid steps.
        return pl.BlockSpec(a.shape, lambda i, _nd=nd: (0,) * _nd)

    in_specs = [pl.BlockSpec((TB, input_dim), lambda i: (i, 0))] + [
        resident(a) for a in ordered
    ]
    out_spec = pl.BlockSpec((TB, 2 * H), lambda i: (i, 0))

    packed = pl.pallas_call(
        ae_rtm_encoder_kernel,
        grid=grid,
        in_specs=in_specs,
        out_specs=out_spec,
        out_shape=jax.ShapeDtypeStruct((B, 2 * H), jnp.float32),
        compiler_params=pltpu.CompilerParams(
            dimension_semantics=("parallel",),
        ),
    )(x_bf, *ordered)

    return packed[:, :H], packed[:, H:]


def init_params(key, input_dim, hidden_dim):
    """Deterministic parameter init mimicking PyTorch defaults.

    Linear: U(-1/sqrt(fan_in), 1/sqrt(fan_in)) for weight and bias.
    LayerNorm: gamma=1, beta=0.  Weights stored (in, out); 1-D vectors stored
    as (1, N) for TPU layout friendliness (broadcast over batch in-kernel).
    """
    dims = [input_dim, 64, 32, 16, hidden_dim]
    params = {}
    keys = jax.random.split(key, 8)
    k = 0
    for li, (din, dout) in enumerate(zip(dims[:-1], dims[1:]), start=1):
        bound = 1.0 / jnp.sqrt(jnp.float32(din))
        w = jax.random.uniform(keys[k], (din, dout), jnp.float32, -bound, bound)
        b = jax.random.uniform(keys[k + 1], (1, dout), jnp.float32, -bound, bound)
        k += 2
        params[f"w{li}"] = w
        params[f"b{li}"] = b
        if li < 4:  # LayerNorm follows the first three Linear layers only
            params[f"g{li}"] = jnp.ones((1, dout), jnp.float32)
            params[f"be{li}"] = jnp.zeros((1, dout), jnp.float32)
    return params


if __name__ == "__main__":
    # hidden_dim must equal the number of RTM parameters (8):
    # cab, cw, cm, LAI, cp, cbc, car, anth
    INPUT_DIM = 16
    HIDDEN_DIM = 8
    BATCH = 64
    TILE_B = 32  # small tile so the demo exercises a multi-step parallel grid

    key = jax.random.PRNGKey(0)
    kx, kp = jax.random.split(key)
    x = jax.random.normal(kx, (BATCH, INPUT_DIM), jnp.float32)
    params = init_params(kp, INPUT_DIM, HIDDEN_DIM)

    encoded, para_tensor = ae_rtm_forward(x, params, tile_b=TILE_B)
    jax.block_until_ready((encoded, para_tensor))

    # Pure-JAX reference mirroring the kernel's numerics (bf16 matmul inputs,
    # f32 accumulation and LayerNorm).
    def ref(x, p):
        def lin(h, w, b):
            return jnp.dot(h.astype(jnp.bfloat16), w.astype(jnp.bfloat16),
                           preferred_element_type=jnp.float32) + b

        h = jax.nn.relu(_layernorm(lin(x, p["w1"], p["b1"]), p["g1"], p["be1"]))
        h = jax.nn.relu(_layernorm(lin(h, p["w2"], p["b2"]), p["g2"], p["be2"]))
        h = jax.nn.relu(_layernorm(lin(h, p["w3"], p["b3"]), p["g3"], p["be3"]))
        enc = lin(h, p["w4"], p["b4"])
        para = enc.at[:, 5].set(enc[:, 2] - enc[:, 4])
        return enc, para

    enc_ref, para_ref = ref(x, params)
    assert jnp.allclose(encoded, enc_ref, atol=2e-2, rtol=2e-2)
    assert jnp.allclose(para_tensor, para_ref, atol=2e-2, rtol=2e-2)

    print("KERNEL_OK")
</pallas_src>

<mosaic_0001>
module attributes {stable_mosaic.version = 11 : i64} {
  func.func @ae_rtm_encoder_kernel(%arg0: i32, %arg1: memref<32x16xbf16, #tpu.memory_space<vmem>>, %arg2: memref<16x64xbf16, #tpu.memory_space<vmem>>, %arg3: memref<1x64xf32, #tpu.memory_space<vmem>>, %arg4: memref<1x64xf32, #tpu.memory_space<vmem>>, %arg5: memref<1x64xf32, #tpu.memory_space<vmem>>, %arg6: memref<64x32xbf16, #tpu.memory_space<vmem>>, %arg7: memref<1x32xf32, #tpu.memory_space<vmem>>, %arg8: memref<1x32xf32, #tpu.memory_space<vmem>>, %arg9: memref<1x32xf32, #tpu.memory_space<vmem>>, %arg10: memref<32x16xbf16, #tpu.memory_space<vmem>>, %arg11: memref<1x16xf32, #tpu.memory_space<vmem>>, %arg12: memref<1x16xf32, #tpu.memory_space<vmem>>, %arg13: memref<1x16xf32, #tpu.memory_space<vmem>>, %arg14: memref<16x8xbf16, #tpu.memory_space<vmem>>, %arg15: memref<1x8xf32, #tpu.memory_space<vmem>>, %arg16: memref<32x16xf32, #tpu.memory_space<vmem>>) attributes {dimension_semantics = [#tpu.dimension_semantics<parallel>], iteration_bounds = array<i64: 2>, scalar_prefetch = 0 : i64, scratch_operands = 0 : i64, tpu.core_type = #tpu.core_type<tc>, window_params = [{transform_indices = @transform_0, window_bounds = array<i64: 32, 16>}, {pipeline_mode = #tpu.pipeline_mode<synchronous>, transform_indices = @transform_1, window_bounds = array<i64: 16, 64>}, {pipeline_mode = #tpu.pipeline_mode<synchronous>, transform_indices = @transform_2, window_bounds = array<i64: 1, 64>}, {pipeline_mode = #tpu.pipeline_mode<synchronous>, transform_indices = @transform_3, window_bounds = array<i64: 1, 64>}, {pipeline_mode = #tpu.pipeline_mode<synchronous>, transform_indices = @transform_4, window_bounds = array<i64: 1, 64>}, {pipeline_mode = #tpu.pipeline_mode<synchronous>, transform_indices = @transform_5, window_bounds = array<i64: 64, 32>}, {pipeline_mode = #tpu.pipeline_mode<synchronous>, transform_indices = @transform_6, window_bounds = array<i64: 1, 32>}, {pipeline_mode = #tpu.pipeline_mode<synchronous>, transform_indices = @transform_7, window_bounds = array<i64: 1, 32>}, {pipeline_mode = #tpu.pipeline_mode<synchronous>, transform_indices = @transform_8, window_bounds = array<i64: 1, 32>}, {pipeline_mode = #tpu.pipeline_mode<synchronous>, transform_indices = @transform_9, window_bounds = array<i64: 32, 16>}, {pipeline_mode = #tpu.pipeline_mode<synchronous>, transform_indices = @transform_10, window_bounds = array<i64: 1, 16>}, {pipeline_mode = #tpu.pipeline_mode<synchronous>, transform_indices = @transform_11, window_bounds = array<i64: 1, 16>}, {pipeline_mode = #tpu.pipeline_mode<synchronous>, transform_indices = @transform_12, window_bounds = array<i64: 1, 16>}, {pipeline_mode = #tpu.pipeline_mode<synchronous>, transform_indices = @transform_13, window_bounds = array<i64: 16, 8>}, {pipeline_mode = #tpu.pipeline_mode<synchronous>, transform_indices = @transform_14, window_bounds = array<i64: 1, 8>}, {transform_indices = @transform_15, window_bounds = array<i64: 32, 16>}]} {
    %c0 = arith.constant 0 : index
    %c0_0 = arith.constant 0 : index
    %0 = vector.load %arg1[%c0, %c0_0] : memref<32x16xbf16, #tpu.memory_space<vmem>>, vector<32x16xbf16>
    %c0_1 = arith.constant 0 : index
    %c0_2 = arith.constant 0 : index
    %1 = vector.load %arg2[%c0_1, %c0_2] : memref<16x64xbf16, #tpu.memory_space<vmem>>, vector<16x64xbf16>
    %cst = arith.constant dense<0.000000e+00> : vector<32x64xf32>
    %2 = tpu.matmul %0, %1, %cst {dimension_numbers = #tpu.dot_dimension_numbers<[1], [0], [0], [1], [0, 0, 1, 1], [], []>} : vector<32x16xbf16>, vector<16x64xbf16>, vector<32x64xf32> -> vector<32x64xf32>
    %c0_3 = arith.constant 0 : index
    %c0_4 = arith.constant 0 : index
    %3 = vector.load %arg3[%c0_3, %c0_4] : memref<1x64xf32, #tpu.memory_space<vmem>>, vector<1x64xf32>
    %4 = vector.broadcast %3 : vector<1x64xf32> to vector<32x64xf32>
    %5 = arith.addf %2, %4 : vector<32x64xf32>
    %c0_5 = arith.constant 0 : index
    %c0_6 = arith.constant 0 : index
    %6 = vector.load %arg4[%c0_5, %c0_6] : memref<1x64xf32, #tpu.memory_space<vmem>>, vector<1x64xf32>
    %c0_7 = arith.constant 0 : index
    %c0_8 = arith.constant 0 : index
    %7 = vector.load %arg5[%c0_7, %c0_8] : memref<1x64xf32, #tpu.memory_space<vmem>>, vector<1x64xf32>
    %cst_9 = arith.constant dense<0.000000e+00> : vector<32xf32>
    %8 = vector.multi_reduction <add>, %5, %cst_9 [1] : vector<32x64xf32> to vector<32xf32>
    %9 = vector.shape_cast %8 : vector<32xf32> to vector<32x1xf32>
    %cst_10 = arith.constant 6.400000e+01 : f32
    %10 = vector.broadcast %cst_10 : f32 to vector<32x1xf32>
    %11 = arith.divf %9, %10 : vector<32x1xf32>
    %12 = vector.broadcast %11 : vector<32x1xf32> to vector<32x64xf32>
    %13 = arith.subf %5, %12 : vector<32x64xf32>
    %14 = arith.mulf %13, %13 : vector<32x64xf32>
    %cst_11 = arith.constant dense<0.000000e+00> : vector<32xf32>
    %15 = vector.multi_reduction <add>, %14, %cst_11 [1] : vector<32x64xf32> to vector<32xf32>
    %16 = vector.shape_cast %15 : vector<32xf32> to vector<32x1xf32>
    %cst_12 = arith.constant 6.400000e+01 : f32
    %17 = vector.broadcast %cst_12 : f32 to vector<32x1xf32>
    %18 = arith.divf %16, %17 : vector<32x1xf32>
    %19 = vector.broadcast %11 : vector<32x1xf32> to vector<32x64xf32>
    %20 = arith.subf %5, %19 : vector<32x64xf32>
    %cst_13 = arith.constant 9.99999974E-6 : f32
    %21 = vector.broadcast %cst_13 : f32 to vector<32x1xf32>
    %22 = arith.addf %18, %21 : vector<32x1xf32>
    %23 = math.rsqrt %22 : vector<32x1xf32>
    %24 = vector.broadcast %23 : vector<32x1xf32> to vector<32x64xf32>
    %25 = arith.mulf %20, %24 : vector<32x64xf32>
    %26 = vector.broadcast %6 : vector<1x64xf32> to vector<32x64xf32>
    %27 = arith.mulf %25, %26 : vector<32x64xf32>
    %28 = vector.broadcast %7 : vector<1x64xf32> to vector<32x64xf32>
    %29 = arith.addf %27, %28 : vector<32x64xf32>
    %cst_14 = arith.constant 0.000000e+00 : f32
    %30 = vector.broadcast %cst_14 : f32 to vector<32x64xf32>
    %31 = arith.maximumf %29, %30 : vector<32x64xf32>
    %32 = arith.truncf %31 : vector<32x64xf32> to vector<32x64xbf16>
    %c0_15 = arith.constant 0 : index
    %c0_16 = arith.constant 0 : index
    %33 = vector.load %arg6[%c0_15, %c0_16] : memref<64x32xbf16, #tpu.memory_space<vmem>>, vector<64x32xbf16>
    %cst_17 = arith.constant dense<0.000000e+00> : vector<32x32xf32>
    %34 = tpu.matmul %32, %33, %cst_17 {dimension_numbers = #tpu.dot_dimension_numbers<[1], [0], [0], [1], [0, 0, 1, 1], [], []>} : vector<32x64xbf16>, vector<64x32xbf16>, vector<32x32xf32> -> vector<32x32xf32>
    %c0_18 = arith.constant 0 : index
    %c0_19 = arith.constant 0 : index
    %35 = vector.load %arg7[%c0_18, %c0_19] : memref<1x32xf32, #tpu.memory_space<vmem>>, vector<1x32xf32>
    %36 = vector.broadcast %35 : vector<1x32xf32> to vector<32x32xf32>
    %37 = arith.addf %34, %36 : vector<32x32xf32>
    %c0_20 = arith.constant 0 : index
    %c0_21 = arith.constant 0 : index
    %38 = vector.load %arg8[%c0_20, %c0_21] : memref<1x32xf32, #tpu.memory_space<vmem>>, vector<1x32xf32>
    %c0_22 = arith.constant 0 : index
    %c0_23 = arith.constant 0 : index
    %39 = vector.load %arg9[%c0_22, %c0_23] : memref<1x32xf32, #tpu.memory_space<vmem>>, vector<1x32xf32>
    %cst_24 = arith.constant dense<0.000000e+00> : vector<32xf32>
    %40 = vector.multi_reduction <add>, %37, %cst_24 [1] : vector<32x32xf32> to vector<32xf32>
    %41 = vector.shape_cast %40 : vector<32xf32> to vector<32x1xf32>
    %cst_25 = arith.constant 3.200000e+01 : f32
    %42 = vector.broadcast %cst_25 : f32 to vector<32x1xf32>
    %43 = arith.divf %41, %42 : vector<32x1xf32>
    %44 = vector.broadcast %43 : vector<32x1xf32> to vector<32x32xf32>
    %45 = arith.subf %37, %44 : vector<32x32xf32>
    %46 = arith.mulf %45, %45 : vector<32x32xf32>
    %cst_26 = arith.constant dense<0.000000e+00> : vector<32xf32>
    %47 = vector.multi_reduction <add>, %46, %cst_26 [1] : vector<32x32xf32> to vector<32xf32>
    %48 = vector.shape_cast %47 : vector<32xf32> to vector<32x1xf32>
    %cst_27 = arith.constant 3.200000e+01 : f32
    %49 = vector.broadcast %cst_27 : f32 to vector<32x1xf32>
    %50 = arith.divf %48, %49 : vector<32x1xf32>
    %51 = vector.broadcast %43 : vector<32x1xf32> to vector<32x32xf32>
    %52 = arith.subf %37, %51 : vector<32x32xf32>
    %cst_28 = arith.constant 9.99999974E-6 : f32
    %53 = vector.broadcast %cst_28 : f32 to vector<32x1xf32>
    %54 = arith.addf %50, %53 : vector<32x1xf32>
    %55 = math.rsqrt %54 : vector<32x1xf32>
    %56 = vector.broadcast %55 : vector<32x1xf32> to vector<32x32xf32>
    %57 = arith.mulf %52, %56 : vector<32x32xf32>
    %58 = vector.broadcast %38 : vector<1x32xf32> to vector<32x32xf32>
    %59 = arith.mulf %57, %58 : vector<32x32xf32>
    %60 = vector.broadcast %39 : vector<1x32xf32> to vector<32x32xf32>
    %61 = arith.addf %59, %60 : vector<32x32xf32>
    %cst_29 = arith.constant 0.000000e+00 : f32
    %62 = vector.broadcast %cst_29 : f32 to vector<32x32xf32>
    %63 = arith.maximumf %61, %62 : vector<32x32xf32>
    %64 = arith.truncf %63 : vector<32x32xf32> to vector<32x32xbf16>
    %c0_30 = arith.constant 0 : index
    %c0_31 = arith.constant 0 : index
    %65 = vector.load %arg10[%c0_30, %c0_31] : memref<32x16xbf16, #tpu.memory_space<vmem>>, vector<32x16xbf16>
    %cst_32 = arith.constant dense<0.000000e+00> : vector<32x16xf32>
    %66 = tpu.matmul %64, %65, %cst_32 {dimension_numbers = #tpu.dot_dimension_numbers<[1], [0], [0], [1], [0, 0, 1, 1], [], []>} : vector<32x32xbf16>, vector<32x16xbf16>, vector<32x16xf32> -> vector<32x16xf32>
    %c0_33 = arith.constant 0 : index
    %c0_34 = arith.constant 0 : index
    %67 = vector.load %arg11[%c0_33, %c0_34] : memref<1x16xf32, #tpu.memory_space<vmem>>, vector<1x16xf32>
    %68 = vector.broadcast %67 : vector<1x16xf32> to vector<32x16xf32>
    %69 = arith.addf %66, %68 : vector<32x16xf32>
    %c0_35 = arith.constant 0 : index
    %c0_36 = arith.constant 0 : index
    %70 = vector.load %arg12[%c0_35, %c0_36] : memref<1x16xf32, #tpu.memory_space<vmem>>, vector<1x16xf32>
    %c0_37 = arith.constant 0 : index
    %c0_38 = arith.constant 0 : index
    %71 = vector.load %arg13[%c0_37, %c0_38] : memref<1x16xf32, #tpu.memory_space<vmem>>, vector<1x16xf32>
    %cst_39 = arith.constant dense<0.000000e+00> : vector<32xf32>
    %72 = vector.multi_reduction <add>, %69, %cst_39 [1] : vector<32x16xf32> to vector<32xf32>
    %73 = vector.shape_cast %72 : vector<32xf32> to vector<32x1xf32>
    %cst_40 = arith.constant 1.600000e+01 : f32
    %74 = vector.broadcast %cst_40 : f32 to vector<32x1xf32>
    %75 = arith.divf %73, %74 : vector<32x1xf32>
    %76 = vector.broadcast %75 : vector<32x1xf32> to vector<32x16xf32>
    %77 = arith.subf %69, %76 : vector<32x16xf32>
    %78 = arith.mulf %77, %77 : vector<32x16xf32>
    %cst_41 = arith.constant dense<0.000000e+00> : vector<32xf32>
    %79 = vector.multi_reduction <add>, %78, %cst_41 [1] : vector<32x16xf32> to vector<32xf32>
    %80 = vector.shape_cast %79 : vector<32xf32> to vector<32x1xf32>
    %cst_42 = arith.constant 1.600000e+01 : f32
    %81 = vector.broadcast %cst_42 : f32 to vector<32x1xf32>
    %82 = arith.divf %80, %81 : vector<32x1xf32>
    %83 = vector.broadcast %75 : vector<32x1xf32> to vector<32x16xf32>
    %84 = arith.subf %69, %83 : vector<32x16xf32>
    %cst_43 = arith.constant 9.99999974E-6 : f32
    %85 = vector.broadcast %cst_43 : f32 to vector<32x1xf32>
    %86 = arith.addf %82, %85 : vector<32x1xf32>
    %87 = math.rsqrt %86 : vector<32x1xf32>
    %88 = vector.broadcast %87 : vector<32x1xf32> to vector<32x16xf32>
    %89 = arith.mulf %84, %88 : vector<32x16xf32>
    %90 = vector.broadcast %70 : vector<1x16xf32> to vector<32x16xf32>
    %91 = arith.mulf %89, %90 : vector<32x16xf32>
    %92 = vector.broadcast %71 : vector<1x16xf32> to vector<32x16xf32>
    %93 = arith.addf %91, %92 : vector<32x16xf32>
    %cst_44 = arith.constant 0.000000e+00 : f32
    %94 = vector.broadcast %cst_44 : f32 to vector<32x16xf32>
    %95 = arith.maximumf %93, %94 : vector<32x16xf32>
    %96 = arith.truncf %95 : vector<32x16xf32> to vector<32x16xbf16>
    %c0_45 = arith.constant 0 : index
    %c0_46 = arith.constant 0 : index
    %97 = vector.load %arg14[%c0_45, %c0_46] : memref<16x8xbf16, #tpu.memory_space<vmem>>, vector<16x8xbf16>
    %cst_47 = arith.constant dense<0.000000e+00> : vector<32x8xf32>
    %98 = tpu.matmul %96, %97, %cst_47 {dimension_numbers = #tpu.dot_dimension_numbers<[1], [0], [0], [1], [0, 0, 1, 1], [], []>} : vector<32x16xbf16>, vector<16x8xbf16>, vector<32x8xf32> -> vector<32x8xf32>
    %c0_48 = arith.constant 0 : index
    %c0_49 = arith.constant 0 : index
    %99 = vector.load %arg15[%c0_48, %c0_49] : memref<1x8xf32, #tpu.memory_space<vmem>>, vector<1x8xf32>
    %100 = vector.broadcast %99 : vector<1x8xf32> to vector<32x8xf32>
    %101 = arith.addf %98, %100 : vector<32x8xf32>
    %c0_50 = arith.constant 0 : index
    %c0_51 = arith.constant 0 : index
    %102 = vector.load %arg16[%c0_50, %c0_51] : memref<32x16xf32, #tpu.memory_space<vmem>>, vector<32x8xf32>
    tpu.vector_store %arg16[%c0_50, %c0_51], %101 {strides = array<i32>} : memref<32x16xf32, #tpu.memory_space<vmem>>, vector<32x8xf32>,
    %c0_52 = arith.constant 0 : index
    %c8 = arith.constant 8 : index
    %103 = vector.load %arg16[%c0_52, %c8] : memref<32x16xf32, #tpu.memory_space<vmem>>, vector<32x8xf32>
    tpu.vector_store %arg16[%c0_52, %c8], %101 {strides = array<i32>} : memref<32x16xf32, #tpu.memory_space<vmem>>, vector<32x8xf32>,
    %104 = vector.extract_strided_slice %101 {offsets = [0, 2], sizes = [32, 1], strides = [1, 1]} : vector<32x8xf32> to vector<32x1xf32>
    %105 = vector.extract_strided_slice %101 {offsets = [0, 4], sizes = [32, 1], strides = [1, 1]} : vector<32x8xf32> to vector<32x1xf32>
    %106 = arith.subf %104, %105 : vector<32x1xf32>
    %c0_53 = arith.constant 0 : index
    %c13 = arith.constant 13 : index
    %107 = vector.load %arg16[%c0_53, %c13] : memref<32x16xf32, #tpu.memory_space<vmem>>, vector<32x1xf32>
    tpu.vector_store %arg16[%c0_53, %c13], %106 {strides = array<i32>} : memref<32x16xf32, #tpu.memory_space<vmem>>, vector<32x1xf32>,
    return
  }
  func.func @transform_0(%arg0: i32) -> (i32, i32) {
    %c0_i32 = arith.constant 0 : i32
    %c0_i32_0 = arith.constant 0 : i32
    return %arg0, %c0_i32 : i32, i32
  }
  func.func @transform_1(%arg0: i32) -> (i32, i32) {
    %c0_i32 = arith.constant 0 : i32
    %c0_i32_0 = arith.constant 0 : i32
    %c0_i32_1 = arith.constant 0 : i32
    return %c0_i32, %c0_i32_0 : i32, i32
  }
  func.func @transform_2(%arg0: i32) -> (i32, i32) {
    %c0_i32 = arith.constant 0 : i32
    %c0_i32_0 = arith.constant 0 : i32
    %c0_i32_1 = arith.constant 0 : i32
    return %c0_i32, %c0_i32_0 : i32, i32
  }
  func.func @transform_3(%arg0: i32) -> (i32, i32) {
    %c0_i32 = arith.constant 0 : i32
    %c0_i32_0 = arith.constant 0 : i32
    %c0_i32_1 = arith.constant 0 : i32
    return %c0_i32, %c0_i32_0 : i32, i32
  }
  func.func @transform_4(%arg0: i32) -> (i32, i32) {
    %c0_i32 = arith.constant 0 : i32
    %c0_i32_0 = arith.constant 0 : i32
    %c0_i32_1 = arith.constant 0 : i32
    return %c0_i32, %c0_i32_0 : i32, i32
  }
  func.func @transform_5(%arg0: i32) -> (i32, i32) {
    %c0_i32 = arith.constant 0 : i32
    %c0_i32_0 = arith.constant 0 : i32
    %c0_i32_1 = arith.constant 0 : i32
    return %c0_i32, %c0_i32_0 : i32, i32
  }
  func.func @transform_6(%arg0: i32) -> (i32, i32) {
    %c0_i32 = arith.constant 0 : i32
    %c0_i32_0 = arith.constant 0 : i32
    %c0_i32_1 = arith.constant 0 : i32
    return %c0_i32, %c0_i32_0 : i32, i32
  }
  func.func @transform_7(%arg0: i32) -> (i32, i32) {
    %c0_i32 = arith.constant 0 : i32
    %c0_i32_0 = arith.constant 0 : i32
    %c0_i32_1 = arith.constant 0 : i32
    return %c0_i32, %c0_i32_0 : i32, i32
  }
  func.func @transform_8(%arg0: i32) -> (i32, i32) {
    %c0_i32 = arith.constant 0 : i32
    %c0_i32_0 = arith.constant 0 : i32
    %c0_i32_1 = arith.constant 0 : i32
    return %c0_i32, %c0_i32_0 : i32, i32
  }
  func.func @transform_9(%arg0: i32) -> (i32, i32) {
    %c0_i32 = arith.constant 0 : i32
    %c0_i32_0 = arith.constant 0 : i32
    %c0_i32_1 = arith.constant 0 : i32
    return %c0_i32, %c0_i32_0 : i32, i32
  }
  func.func @transform_10(%arg0: i32) -> (i32, i32) {
    %c0_i32 = arith.constant 0 : i32
    %c0_i32_0 = arith.constant 0 : i32
    %c0_i32_1 = arith.constant 0 : i32
    return %c0_i32, %c0_i32_0 : i32, i32
  }
  func.func @transform_11(%arg0: i32) -> (i32, i32) {
    %c0_i32 = arith.constant 0 : i32
    %c0_i32_0 = arith.constant 0 : i32
    %c0_i32_1 = arith.constant 0 : i32
    return %c0_i32, %c0_i32_0 : i32, i32
  }
  func.func @transform_12(%arg0: i32) -> (i32, i32) {
    %c0_i32 = arith.constant 0 : i32
    %c0_i32_0 = arith.constant 0 : i32
    %c0_i32_1 = arith.constant 0 : i32
    return %c0_i32, %c0_i32_0 : i32, i32
  }
  func.func @transform_13(%arg0: i32) -> (i32, i32) {
    %c0_i32 = arith.constant 0 : i32
    %c0_i32_0 = arith.constant 0 : i32
    %c0_i32_1 = arith.constant 0 : i32
    return %c0_i32, %c0_i32_0 : i32, i32
  }
  func.func @transform_14(%arg0: i32) -> (i32, i32) {
    %c0_i32 = arith.constant 0 : i32
    %c0_i32_0 = arith.constant 0 : i32
    %c0_i32_1 = arith.constant 0 : i32
    return %c0_i32, %c0_i32_0 : i32, i32
  }
  func.func @transform_15(%arg0: i32) -> (i32, i32) {
    %c0_i32 = arith.constant 0 : i32
    %c0_i32_0 = arith.constant 0 : i32
    return %arg0, %c0_i32 : i32, i32
  }
}

</mosaic_0001>

<bundles_post_ra>
// kernel: tpu_custom_call.1
= control target key start
LH: loop header
LB: loop body
LE: loop exit
PB: predicated region body
PF: predicated region fallthrough
CT: control target
= control target key end

     0   :  { %s1413_s18 = smov 0   ;;  %s1538_s0 = inlined_call_operand.vmem [shape: bf16[64,16], index: 0, kind: input, shape index: {}]   ;;  %s1539_s1 = inlined_call_operand.vmem [shape: bf16[16,64], index: 1, kind: input, shape index: {}]   ;;  %s1540_s2 = inlined_call_operand.vmem [shape: f32[1,64], index: 2, kind: input, shape index: {}]   ;;  %s1541_s3 = inlined_call_operand.vmem [shape: f32[1,64], index: 3, kind: input, shape index: {}]   ;;  %s1542_s4 = inlined_call_operand.vmem [shape: f32[1,64], index: 4, kind: input, shape index: {}]   ;;  %s1543_s5 = inlined_call_operand.vmem [shape: bf16[64,32], index: 5, kind: input, shape index: {}]   ;;  %s1544_s6 = inlined_call_operand.vmem [shape: f32[1,32], index: 6, kind: input, shape index: {}]   ;;  %s1545_s7 = inlined_call_operand.vmem [shape: f32[1,32], index: 7, kind: input, shape index: {}]   ;;  %s1546_s8 = inlined_call_operand.vmem [shape: f32[1,32], index: 8, kind: input, shape index: {}]   ;;  %s1547_s9 = inlined_call_operand.vmem [shape: bf16[32,16], index: 9, kind: input, shape index: {}]   ;;  %s1548_s10 = inlined_call_operand.vmem [shape: f32[1,16], index: 10, kind: input, shape index: {}]   ;;  %s1549_s11 = inlined_call_operand.vmem [shape: f32[1,16], index: 11, kind: input, shape index: {}]   ;;  %s1550_s12 = inlined_call_operand.vmem [shape: f32[1,16], index: 12, kind: input, shape index: {}]   ;;  %s1551_s13 = inlined_call_operand.vmem [shape: bf16[16,8], index: 13, kind: input, shape index: {}]   ;;  %s1552_s14 = inlined_call_operand.vmem [shape: f32[1,8], index: 14, kind: input, shape index: {}]   ;;  %s1553_s15 = inlined_call_operand.vmem [shape: f32[64,16], index: 15, kind: output, shape index: {}]  }
   0x1 LB: > { %s1190_s19 = sadd.s32 4294967295, %s1328_s18   ;;  %p1194_p0 = scmp.ge.s32.totalorder %s1328_s18, 1  ;;  %s1328_s18 = sphi %s1413_s18, %s25_s18  }
   0x2   : > { %p438_p1 = scmp.lt.s32.totalorder %s1328_s18, 3 }
   0x4   : > { %p439_p2 = pnand %p1194_p0, %p438_p1 }
   0x5   : > { %v1288_v0 = vld [vmem:[%s1539_s1] sm:$0xff] (!%p439_p2)   ;;  %s1195_s22 = sshll.u32 (!%p439_p2), %s1190_s19, 2  ;;  %vm528_vm0 = vcmask (!%p439_p2), 130048   ;;  %vm586_vm1 = vcmask (!%p439_p2), 523264   ;;  %v1292_v37 = vld [vmem:[%s1543_s5 + $0x8] sm:$0xff] (!%p439_p2)   ;;  %v1293_v38 = vld [vmem:[%s1543_s5 + $0x10] sm:$0xff] (!%p439_p2)  }
   0x6   : > { %442 = sbr.rel (%p439_p2) target bundleno = 2089 (0x829), region = 80  ;;  %p487_p3 = scmp.lt.s32.totalorder (!%p439_p2), %s1195_s22, 7  ;;  %1245 = vmatprep.subr.bf16.mxu0 (!%p439_p2), %v1288_v0  ;;  %v1199_v3 = vld [vmem:[%s1540_s2] ss:$0 sm:$0xff] (!%p439_p2)  ;;  %v1294_v39 = vld [vmem:[%s1543_s5 + $0x18] sm:$0xff] (!%p439_p2)   ;;  %vm762_vm2 = vcmask (!%p439_p2), 261120  }
   0x7   : > { %1246 = vmatpush3.bf16.msra.mxu0 (!%p439_p2), %v1288_v0  ;;  %v1291_v36 = vld [vmem:[%s1543_s5] sm:$0xff] (!%p439_p2)   ;;  %vm1071_vm3 = vcmask (!%p439_p2), 64512   ;;  %vm1092_vm4 = vcmask (!%p439_p2), 130112   ;;  %s1332_s27 = smov (!%p439_p2), 11   ;;  %vm1129_vm5 = vcmask (!%p439_p2), 113768  }
   0x8   : > { %1251 = vmatprep.subr.bf16.mxu1 (!%p439_p2), %v1291_v36  ;;  %v1205_v53 = vld [vmem:[%s1541_s3] ss:$0 sm:$0xff] (!%p439_p2) }
   0x9   : > { %1252 = vmatpush3.bf16.msra.mxu1 (!%p439_p2), %v1291_v36  ;;  %v1206_v57 = vld [vmem:[%s1542_s4] ss:$0 sm:$0xff] (!%p439_p2) }
   0xa   : > { %1253 = vmatprep.subr.bf16.mxu1 (!%p439_p2), %v1292_v37 }
   0xd   : > { %s1555_s22 = smov (!%p487_p3, %s1195_s22), 7  ;;  %1254 = vmatpush3.bf16.msra.mxu1 %v1292_v37 }
   0xe   : > { %s1196_s23 = sshll.u32 %s1555_s22, 2  ;;  %1255 = vmatprep.subr.bf16.mxu1 %v1293_v38  ;;  %s1198_s19 = sshll.u32 %s1555_s22, 3 }
   0xf   : > { %s490_s26 = scalar_lea.vmem %s1538_s0, %s1196_s23  ;;  %s1517_s25 = scalar_lea.vmem %s1553_s15, %s1198_s19 }
  0x10   : > { %v1289_v1 = vld [vmem:[%s490_s26] sm:$0xff]   ;;  %v1290_v2 = vld [vmem:[%s490_s26 + $0x8] sm:$0xff]   ;;  %s1330_s22 = smov 126   ;;  %s1331_s26 = smov 8  }
  0x11   : > { %1247 = vmatprep.mubr.msk.bf16.mxu0 %vm528_vm0, %v1289_v1  ;;  %1256 = vmatpush3.bf16.msra.mxu1 %v1293_v38 }
  0x12   : > { %1248 = vmatmul.mubr.msk.bf16.vlgmr.msra.gmra.mrb[0].mxu0 %vm528_vm0, %v1290_v2  ;;  %1257 = vmatprep.subr.bf16.mxu1 %v1294_v39 }
  0x15   : > { %1258 = vmatpush3.bf16.msra.mxu1 %v1294_v39 }
  0xe5   : > { %v1249_v4 = vpop.f32.mrb[0].mxu0 }
  0xe6   : > { %v578_v5 = vadd.f32 %v1249_v4, %v1199_v3  ;;  %v569_v6 = vpop.f32.mrb[1].mxu0 }
  0xe7   : > { %v570_v7 = vadd.f32 %v1199_v3, %v569_v6  ;;  %v1250_v8 = vpop.f32.mrb[2].mxu0 }
  0xe8   : > { %v581_v9 = vadd.f32 %v1250_v8, %v1199_v3  ;;  %v572_v10 = vpop.f32.mrb[3].mxu0  ;;  %v593_v11 = vsel %vm586_vm1, %v578_v5, 0.0 }
  0xe9   : > { %v573_v12 = vadd.f32 %v1199_v3, %v572_v10  ;;  %594 = vadd.xlane.f32.xlu1 %v593_v11  ;;  %v587_v13 = vsel %vm586_vm1, %v570_v7, 0.0 }
  0xea   : > { %588 = vadd.xlane.f32.xlu0 %v587_v13  ;;  %v596_v14 = vsel %vm586_vm1, %v581_v9, 0.0 }
  0xeb   : > { %v590_v15 = vsel %vm586_vm1, %v573_v12, 0.0 }
  0xed   : > { %597 = vadd.xlane.f32.xlu1 %v596_v14 }
  0xee   : > { %591 = vadd.xlane.f32.xlu0 %v590_v15 }
 0x176   : > { %v595_v16 = vpop.xlane.xlu1 %594 }
 0x177   : > { %v602_v17 = vmul.f32 0.015625, %v595_v16  ;;  %v589_v18 = vpop.xlane.xlu0 %588 }
 0x178   : > { %v600_v19 = vmul.f32 0.015625, %v589_v18 }
 0x179   : > { %v606_v20 = vsub.f32 %v578_v5, %v602_v17 }
 0x17a   : > { %v604_v21 = vsub.f32 %v570_v7, %v600_v19  ;;  %v598_v22 = vpop.xlane.xlu1 %597 }
 0x17b   : > { %v603_v23 = vmul.f32 0.015625, %v598_v22  ;;  %v592_v24 = vpop.xlane.xlu0 %591  ;;  %v610_v30 = vmul.f32 %v606_v20, %v606_v20 }
 0x17c   : > { %v601_v25 = vmul.f32 0.015625, %v592_v24  ;;  %v608_v26 = vmul.f32 %v604_v21, %v604_v21 }
 0x17d   : > { %v607_v27 = vsub.f32 %v581_v9, %v603_v23  ;;  %v618_v32 = vsel %vm586_vm1, %v610_v30, 0.0 }
 0x17e   : > { %v605_v28 = vsub.f32 %v573_v12, %v601_v25  ;;  %v612_v29 = vsel %vm586_vm1, %v608_v26, 0.0  ;;  %v1207_v12 = vld [vmem:[%s1544_s6] ss:$0 sm:$0xff] }
 0x17f   : > { %613 = vadd.xlane.f32.xlu0 %v612_v29  ;;  %v611_v34 = vmul.f32 %v607_v27, %v607_v27 }
 0x180   : > { %v609_v31 = vmul.f32 %v605_v28, %v605_v28 }
 0x181   : > { %v621_v35 = vsel %vm586_vm1, %v611_v34, 0.0 }
 0x182   : > { %v615_v33 = vsel %vm586_vm1, %v609_v31, 0.0 }
 0x183   : > { %619 = vadd.xlane.f32.xlu0 %v618_v32  ;;  %616 = vadd.xlane.f32.xlu1 %v615_v33 }
 0x187   : > { %622 = vadd.xlane.f32.xlu1 %v621_v35 }
 0x20c   : > { %v614_v40 = vpop.xlane.xlu0 %613 }
 0x20d   : > { %v624_v41 = vmul.f32 0.015625, %v614_v40 }
 0x20f   : > { %v628_v42 = vadd.f32 1e-05, %v624_v41 }
 0x210   : > { %v617_v43 = vpop.xlane.xlu1 %616  ;;  %v620_v44 = vpop.xlane.xlu0 %619 }
 0x211   : > { %1298 = vrsqrt.f32 %v628_v42  ;;  %v625_v45 = vmul.f32 0.015625, %v617_v43  ;;  %v626_v46 = vmul.f32 0.015625, %v620_v44 }
 0x213   : > { %v629_v47 = vadd.f32 1e-05, %v625_v45  ;;  %v630_v48 = vadd.f32 1e-05, %v626_v46  ;;  %v1295_v45 = vld [vmem:[%s1547_s9] sm:$0xff]   ;;  %v1296_v46 = vld [vmem:[%s1547_s9 + $0x8] sm:$0xff]  }
 0x214   : > { %v623_v49 = vpop.xlane.xlu1 %622  ;;  %1263 = vmatprep.subr.bf16.mxu0 %v1295_v45 }
 0x215   : > { %1300 = vrsqrt.f32 %v629_v47  ;;  %v627_v50 = vmul.f32 0.015625, %v623_v49  ;;  %1264 = vmatpush3.bf16.msra.mxu0 %v1295_v45 }
 0x216   : > { %1302 = vrsqrt.f32 %v630_v48  ;;  %1265 = vmatprep.subr.bf16.mxu0 %v1296_v46 }
 0x217   : > { %v631_v51 = vadd.f32 1e-05, %v627_v50 }
 0x219   : > { %1304 = vrsqrt.f32 %v631_v51  ;;  %1266 = vmatpush3.bf16.msra.mxu0 %v1296_v46 }
 0x21b   : > { %v1299_v52 = vpop.eup %1298 }
 0x21c   : > { %v636_v54 = vmul.f32 %v1299_v52, %v604_v21 }
 0x21e   : > { %v646_v55 = vmul.f32 %v1205_v53, %v636_v54 }
 0x21f   : > { %v1301_v56 = vpop.eup %1300 }
 0x220   : > { %v1303_v58 = vpop.eup %1302  ;;  %v637_v59 = vmul.f32 %v1301_v56, %v605_v28  ;;  %v656_v62 = vadd.f32 %v1206_v57, %v646_v55 }
 0x221   : > { %v638_v60 = vmul.f32 %v1303_v58, %v606_v20 }
 0x222   : > { %v647_v61 = vmul.f32 %v1205_v53, %v637_v59  ;;  %v660_v3 = vmax.f32 %v656_v62, 0.0 }
 0x223   : > { %v1305_v63 = vpop.eup %1304  ;;  %v648_v0 = vmul.f32 %v1205_v53, %v638_v60  ;;  %v1214_v60 = vld [vmem:[%s1545_s7] ss:$0 sm:$0xff] }
 0x224   : > { %v639_v1 = vmul.f32 %v1305_v63, %v607_v27  ;;  %v657_v2 = vadd.f32 %v1206_v57, %v647_v61  ;;  %v1215_v63 = vld [vmem:[%s1546_s8] ss:$0 sm:$0xff] }
 0x225   : > { %v658_v6 = vadd.f32 %v1206_v57, %v648_v0 }
 0x226   : > { %v661_v4 = vmax.f32 %v657_v2, 0.0  ;;  %v649_v5 = vmul.f32 %v1205_v53, %v639_v1 }
 0x227   : > { %v662_v9 = vmax.f32 %v658_v6, 0.0 }
 0x228   : > { %v664_v7 = vpack.c.bf16 %v661_v4, %v660_v3  ;;  %v659_v8 = vadd.f32 %v1206_v57, %v649_v5 }
 0x22a   : > { %1259 = vmatprep.mubr.msk.bf16.mxu1 %vm586_vm1, %v664_v7  ;;  %v663_v10 = vmax.f32 %v659_v8, 0.0 }
 0x22c   : > { %v665_v11 = vpack.c.bf16 %v663_v10, %v662_v9 }
 0x22e   : > { %1260 = vmatmul.mubr.msk.bf16.vlgmr.msra.gmra.mrb[0].mxu1 %vm586_vm1, %v665_v11 }
 0x301   : > { %v1261_v13 = vpop.f32.mrb[0].mxu1 }
 0x302   : > { %v745_v14 = vpop.f32.mrb[1].mxu1  ;;  %v754_v18 = vadd.f32 %v1261_v13, %v1207_v12 }
 0x303   : > { %v746_v15 = vadd.f32 %v1207_v12, %v745_v14  ;;  %v1262_v16 = vpop.f32.mrb[2].mxu1 }
 0x304   : > { %v748_v17 = vpop.f32.mrb[3].mxu1  ;;  %v757_v21 = vadd.f32 %v1262_v16, %v1207_v12  ;;  %v769_v23 = vsel %vm762_vm2, %v754_v18, 0.0 }
 0x305   : > { %v749_v19 = vadd.f32 %v1207_v12, %v748_v17  ;;  %v763_v20 = vsel %vm762_vm2, %v746_v15, 0.0 }
 0x306   : > { %764 = vadd.xlane.f32.xlu0 %v763_v20  ;;  %v772_v24 = vsel %vm762_vm2, %v757_v21, 0.0 }
 0x307   : > { %v766_v22 = vsel %vm762_vm2, %v749_v19, 0.0 }
 0x308   : > { %767 = vadd.xlane.f32.xlu1 %v766_v22 }
 0x30a   : > { %770 = vadd.xlane.f32.xlu0 %v769_v23 }
 0x30c   : > { %773 = vadd.xlane.f32.xlu1 %v772_v24 }
 0x393   : > { %v765_v25 = vpop.xlane.xlu0 %764 }
 0x394   : > { %v776_v26 = vmul.f32 0.03125, %v765_v25 }
 0x395   : > { %v768_v27 = vpop.xlane.xlu1 %767 }
 0x396   : > { %v780_v28 = vsub.f32 %v746_v15, %v776_v26  ;;  %v777_v29 = vmul.f32 0.03125, %v768_v27 }
 0x397   : > { %v771_v30 = vpop.xlane.xlu0 %770 }
 0x398   : > { %v781_v31 = vsub.f32 %v749_v19, %v777_v29  ;;  %v778_v32 = vmul.f32 0.03125, %v771_v30  ;;  %v784_v33 = vmul.f32 %v780_v28, %v780_v28  ;;  %v1216_v19 = vld [vmem:[%s1548_s10] ss:$0 sm:$0xff] }
 0x399   : > { %v774_v34 = vpop.xlane.xlu1 %773 }
 0x39a   : > { %v782_v35 = vsub.f32 %v754_v18, %v778_v32  ;;  %v779_v36 = vmul.f32 0.03125, %v774_v34  ;;  %v788_v37 = vsel %vm762_vm2, %v784_v33, 0.0  ;;  %v785_v38 = vmul.f32 %v781_v31, %v781_v31 }
 0x39b   : > { %789 = vadd.xlane.f32.xlu0 %v788_v37 }
 0x39c   : > { %v783_v39 = vsub.f32 %v757_v21, %v779_v36  ;;  %v791_v40 = vsel %vm762_vm2, %v785_v38, 0.0  ;;  %v786_v41 = vmul.f32 %v782_v35, %v782_v35 }
 0x39d   : > { %792 = vadd.xlane.f32.xlu1 %v791_v40 }
 0x39e   : > { %v794_v42 = vsel %vm762_vm2, %v786_v41, 0.0  ;;  %v787_v43 = vmul.f32 %v783_v39, %v783_v39 }
 0x39f   : > { %795 = vadd.xlane.f32.xlu0 %v794_v42 }
 0x3a0   : > { %v797_v44 = vsel %vm762_vm2, %v787_v43, 0.0 }
 0x3a1   : > { %798 = vadd.xlane.f32.xlu1 %v797_v44 }
 0x428   : > { %v790_v47 = vpop.xlane.xlu0 %789 }
 0x429   : > { %v800_v48 = vmul.f32 0.03125, %v790_v47 }
 0x42a   : > { %v793_v49 = vpop.xlane.xlu1 %792 }
 0x42b   : > { %v804_v50 = vadd.f32 1e-05, %v800_v48  ;;  %v801_v51 = vmul.f32 0.03125, %v793_v49 }
 0x42c   : > { %v796_v52 = vpop.xlane.xlu0 %795 }
 0x42d   : > { %1306 = vrsqrt.f32 %v804_v50  ;;  %v805_v53 = vadd.f32 1e-05, %v801_v51  ;;  %v802_v54 = vmul.f32 0.03125, %v796_v52  ;;  %v1297_v52 = vld [vmem:[%s1551_s13] sm:$0xff]  }
 0x42e   : > { %v799_v55 = vpop.xlane.xlu1 %798  ;;  %1271 = vmatprep.subr.bf16.mxu0 %v1297_v52 }
 0x42f   : > { %1308 = vrsqrt.f32 %v805_v53  ;;  %v806_v56 = vadd.f32 1e-05, %v802_v54  ;;  %v803_v57 = vmul.f32 0.03125, %v799_v55 }
 0x431   : > { %1310 = vrsqrt.f32 %v806_v56  ;;  %v807_v58 = vadd.f32 1e-05, %v803_v57 }
 0x433   : > { %1312 = vrsqrt.f32 %v807_v58 }
 0x437   : > { %v1307_v59 = vpop.eup %1306 }
 0x438   : > { %v812_v61 = vmul.f32 %v1307_v59, %v780_v28 }
 0x439   : > { %v1309_v62 = vpop.eup %1308 }
 0x43a   : > { %v813_v0 = vmul.f32 %v1309_v62, %v781_v31  ;;  %v822_v1 = vmul.f32 %v1214_v60, %v812_v61 }
 0x43b   : > { %v1311_v2 = vpop.eup %1310 }
 0x43c   : > { %v814_v3 = vmul.f32 %v1311_v2, %v782_v35  ;;  %v823_v4 = vmul.f32 %v1214_v60, %v813_v0  ;;  %v832_v5 = vadd.f32 %v1215_v63, %v822_v1  ;;  %v1221_v2 = vld [vmem:[%s1549_s11] ss:$0 sm:$0xff] }
 0x43d   : > { %v1313_v6 = vpop.eup %1312 }
 0x43e   : > { %v824_v7 = vmul.f32 %v1214_v60, %v814_v3  ;;  %v815_v8 = vmul.f32 %v1313_v6, %v783_v39  ;;  %v833_v9 = vadd.f32 %v1215_v63, %v823_v4  ;;  %v836_v11 = vmax.f32 %v832_v5, 0.0  ;;  %v1222_v5 = vld [vmem:[%s1550_s12] ss:$0 sm:$0xff] }
 0x440   : > { %v825_v10 = vmul.f32 %v1214_v60, %v815_v8  ;;  %v837_v12 = vmax.f32 %v833_v9, 0.0  ;;  %v834_v13 = vadd.f32 %v1215_v63, %v824_v7 }
 0x442   : > { %v840_v14 = vpack.c.bf16 %v837_v12, %v836_v11  ;;  %v835_v15 = vadd.f32 %v1215_v63, %v825_v10  ;;  %v838_v16 = vmax.f32 %v834_v13, 0.0 }
 0x444   : > { %1267 = vmatprep.mubr.msk.bf16.mxu0 %vm762_vm2, %v840_v14  ;;  %v839_v17 = vmax.f32 %v835_v15, 0.0 }
 0x446   : > { %v841_v18 = vpack.c.bf16 %v839_v17, %v838_v16 }
 0x448   : > { %1268 = vmatmul.mubr.msk.bf16.vlgmr.msra.gmra.mrb[4].mxu0 %vm762_vm2, %v841_v18 }
 0x449   : > { %1272 = vmatpush3.bf16.msra.mxu0 %v1297_v52 }
 0x51b   : > { %v1269_v20 = vpop.f32.mrb[4].mxu0 }
 0x51c   : > { %v905_v21 = vpop.f32.mrb[5].mxu0  ;;  %v914_v25 = vadd.f32 %v1269_v20, %v1216_v19 }
 0x51d   : > { %v906_v22 = vadd.f32 %v1216_v19, %v905_v21  ;;  %v1270_v23 = vpop.f32.mrb[6].mxu0 }
 0x51e   : > { %v908_v24 = vpop.f32.mrb[7].mxu0  ;;  %v917_v28 = vadd.f32 %v1270_v23, %v1216_v19  ;;  %v928_v30 = vsel %vm528_vm0, %v914_v25, 0.0 }
 0x51f   : > { %v909_v26 = vadd.f32 %v1216_v19, %v908_v24  ;;  %v922_v27 = vsel %vm528_vm0, %v906_v22, 0.0 }
 0x520   : > { %923 = vadd.xlane.f32.xlu0 %v922_v27  ;;  %v931_v31 = vsel %vm528_vm0, %v917_v28, 0.0 }
 0x521   : > { %v925_v29 = vsel %vm528_vm0, %v909_v26, 0.0 }
 0x522   : > { %926 = vadd.xlane.f32.xlu1 %v925_v29 }
 0x524   : > { %929 = vadd.xlane.f32.xlu0 %v928_v30 }
 0x526   : > { %932 = vadd.xlane.f32.xlu1 %v931_v31 }
 0x5ad   : > { %v924_v32 = vpop.xlane.xlu0 %923 }
 0x5ae   : > { %v935_v33 = vmul.f32 0.0625, %v924_v32 }
 0x5af   : > { %v927_v34 = vpop.xlane.xlu1 %926 }
 0x5b0   : > { %v939_v35 = vsub.f32 %v906_v22, %v935_v33  ;;  %v936_v36 = vmul.f32 0.0625, %v927_v34 }
 0x5b1   : > { %v930_v37 = vpop.xlane.xlu0 %929 }
 0x5b2   : > { %v940_v38 = vsub.f32 %v909_v26, %v936_v36  ;;  %v937_v39 = vmul.f32 0.0625, %v930_v37  ;;  %v943_v40 = vmul.f32 %v939_v35, %v939_v35 }
 0x5b3   : > { %v933_v41 = vpop.xlane.xlu1 %932 }
 0x5b4   : > { %v941_v42 = vsub.f32 %v914_v25, %v937_v39  ;;  %v938_v43 = vmul.f32 0.0625, %v933_v41  ;;  %v947_v44 = vsel %vm528_vm0, %v943_v40, 0.0  ;;  %v944_v45 = vmul.f32 %v940_v38, %v940_v38  ;;  %v1223_v25 = vld [vmem:[%s1552_s14] ss:$0 sm:$0xff] }
 0x5b5   : > { %948 = vadd.xlane.f32.xlu0 %v947_v44 }
 0x5b6   : > { %v942_v46 = vsub.f32 %v917_v28, %v938_v43  ;;  %v950_v47 = vsel %vm528_vm0, %v944_v45, 0.0  ;;  %v945_v48 = vmul.f32 %v941_v42, %v941_v42 }
 0x5b7   : > { %951 = vadd.xlane.f32.xlu1 %v950_v47 }
 0x5b8   : > { %v953_v49 = vsel %vm528_vm0, %v945_v48, 0.0  ;;  %v946_v50 = vmul.f32 %v942_v46, %v942_v46 }
 0x5b9   : > { %954 = vadd.xlane.f32.xlu0 %v953_v49 }
 0x5ba   : > { %v956_v51 = vsel %vm528_vm0, %v946_v50, 0.0 }
 0x5bb   : > { %957 = vadd.xlane.f32.xlu1 %v956_v51 }
 0x642   : > { %v949_v53 = vpop.xlane.xlu0 %948 }
 0x643   : > { %v959_v54 = vmul.f32 0.0625, %v949_v53 }
 0x644   : > { %v952_v55 = vpop.xlane.xlu1 %951 }
 0x645   : > { %v963_v56 = vadd.f32 1e-05, %v959_v54  ;;  %v960_v57 = vmul.f32 0.0625, %v952_v55 }
 0x646   : > { %v955_v58 = vpop.xlane.xlu0 %954 }
 0x647   : > { %1314 = vrsqrt.f32 %v963_v56  ;;  %v964_v59 = vadd.f32 1e-05, %v960_v57  ;;  %v961_v60 = vmul.f32 0.0625, %v955_v58 }
 0x648   : > { %v958_v61 = vpop.xlane.xlu1 %957 }
 0x649   : > { %1316 = vrsqrt.f32 %v964_v59  ;;  %v965_v62 = vadd.f32 1e-05, %v961_v60  ;;  %v962_v63 = vmul.f32 0.0625, %v958_v61 }
 0x64b   : > { %1318 = vrsqrt.f32 %v965_v62  ;;  %v966_v0 = vadd.f32 1e-05, %v962_v63 }
 0x64d   : > { %1320 = vrsqrt.f32 %v966_v0 }
 0x651   : > { %v1315_v1 = vpop.eup %1314 }
 0x652   : > { %v971_v3 = vmul.f32 %v1315_v1, %v939_v35 }
 0x653   : > { %v1317_v4 = vpop.eup %1316 }
 0x654   : > { %v972_v6 = vmul.f32 %v1317_v4, %v940_v38  ;;  %v981_v7 = vmul.f32 %v1221_v2, %v971_v3 }
 0x655   : > { %v1319_v8 = vpop.eup %1318 }
 0x656   : > { %v973_v9 = vmul.f32 %v1319_v8, %v941_v42  ;;  %v982_v10 = vmul.f32 %v1221_v2, %v972_v6  ;;  %v991_v11 = vadd.f32 %v1222_v5, %v981_v7 }
 0x657   : > { %v1321_v12 = vpop.eup %1320 }
 0x658   : > { %v983_v13 = vmul.f32 %v1221_v2, %v973_v9  ;;  %v974_v14 = vmul.f32 %v1321_v12, %v942_v46  ;;  %v992_v15 = vadd.f32 %v1222_v5, %v982_v10  ;;  %v995_v17 = vmax.f32 %v991_v11, 0.0 }
 0x65a   : > { %v984_v16 = vmul.f32 %v1221_v2, %v974_v14  ;;  %v996_v18 = vmax.f32 %v992_v15, 0.0  ;;  %v993_v19 = vadd.f32 %v1222_v5, %v983_v13 }
 0x65c   : > { %v999_v20 = vpack.c.bf16 %v996_v18, %v995_v17  ;;  %v994_v21 = vadd.f32 %v1222_v5, %v984_v16  ;;  %v997_v22 = vmax.f32 %v993_v19, 0.0 }
 0x65e   : > { %1273 = vmatprep.mubr.msk.bf16.mxu0 %vm528_vm0, %v999_v20  ;;  %v998_v23 = vmax.f32 %v994_v21, 0.0 }
 0x660   : > { %v1000_v24 = vpack.c.bf16 %v998_v23, %v997_v22 }
 0x662   : > { %1274 = vmatmul.mubr.msk.bf16.vlgmr.msra.gmra.mrb[8].mxu0 %vm528_vm0, %v1000_v24 }
 0x735   : > { %v1275_v26 = vpop.f32.mrb[8].mxu0 }
 0x736   : > { %v1065_v27 = vadd.f32 %v1275_v26, %v1223_v25  ;;  %v1056_v28 = vpop.f32.mrb[9].mxu0 }
 0x737   : > { %v1057_v29 = vadd.f32 %v1223_v25, %v1056_v28  ;;  %v1276_v30 = vpop.f32.mrb[10].mxu0 }
 0x738   : > { %1101 = vrot.lane.b32.xlu1 %v1065_v27, %s1330_s22  ;;  %v1059_v31 = vpop.f32.mrb[11].mxu0  ;;  %v1068_v33 = vadd.f32 %v1276_v30, %v1223_v25  ;;  %1074 = vst.msk [vmem:[%s1517_s25 + $0x10] sm:$0xff] %vm1071_vm3, %v1065_v27 }
 0x739   : > { %1072 = vst.msk [vmem:[%s1517_s25] sm:$0xff] %vm1071_vm3, %v1057_v29  ;;  %v1060_v32 = vadd.f32 %v1223_v25, %v1059_v31  ;;  %1097 = vrot.lane.b32.xlu0 %v1057_v29, %s1330_s22 }
 0x73a   : > { %1075 = vst.msk [vmem:[%s1517_s25 + $0x18] sm:$0xff] %vm1071_vm3, %v1068_v33 }
 0x73b   : > { %1073 = vst.msk [vmem:[%s1517_s25 + $0x8] sm:$0xff] %vm1071_vm3, %v1060_v32 }
 0x73c   : > { %1099 = vrot.lane.b32.xlu1 %v1060_v32, %s1330_s22 }
 0x73d   : > { %1080 = vrot.lane.b32.xlu0 %v1057_v29, %s1331_s26 }
 0x740   : > { %1103 = vrot.lane.b32.xlu1 %v1068_v33, %s1330_s22 }
 0x741   : > { %1084 = vrot.lane.b32.xlu0 %v1065_v27, %s1331_s26 }
 0x744   : > { %1086 = vrot.lane.b32.xlu1 %v1068_v33, %s1331_s26 }
 0x748   : > { %1082 = vrot.lane.b32.xlu1 %v1060_v32, %s1331_s26 }
 0x7aa   : > { %v1102_v34 = vpop.permute.xlu1 %1101 }
 0x7ab   : > { %v1098_v35 = vpop.permute.xlu0 %1097  ;;  %v1111_v40 = vsub.f32 %v1065_v27, %v1102_v34 }
 0x7ac   : > { %v1109_v36 = vsub.f32 %v1057_v29, %v1098_v35 }
 0x7ae   : > { %v1100_v37 = vpop.permute.xlu1 %1099  ;;  %1117 = vrot.lane.b32.xlu0 %v1109_v36, %s1332_s27 }
 0x7af   : > { %v1110_v38 = vsub.f32 %v1060_v32, %v1100_v37  ;;  %v1081_v39 = vpop.permute.xlu0 %1080 }
 0x7b0   : > { %1093 = vst.msk [vmem:[%s1517_s25] sm:$0xff] %vm1092_vm4, %v1081_v39 }
 0x7b1   : > { %1119 = vrot.lane.b32.xlu1 %v1110_v38, %s1332_s27 }
 0x7b2   : > { %v1104_v41 = vpop.permute.xlu1 %1103  ;;  %1121 = vrot.lane.b32.xlu0 %v1111_v40, %s1332_s27 }
 0x7b3   : > { %v1112_v42 = vsub.f32 %v1068_v33, %v1104_v41  ;;  %v1085_v45 = vpop.permute.xlu0 %1084 }
 0x7b4   : > { %1095 = vst.msk [vmem:[%s1517_s25 + $0x10] sm:$0xff] %vm1092_vm4, %v1085_v45 }
 0x7b5   : > { %1123 = vrot.lane.b32.xlu1 %v1112_v42, %s1332_s27 }
 0x7b6   : > { %v1087_v43 = vpop.permute.xlu1 %1086 }
 0x7b7   : > { %1096 = vst.msk [vmem:[%s1517_s25 + $0x18] sm:$0xff] %vm1092_vm4, %v1087_v43 }
 0x7ba   : > { %v1083_v44 = vpop.permute.xlu1 %1082 }
 0x7bb   : > { %1094 = vst.msk [vmem:[%s1517_s25 + $0x8] sm:$0xff] %vm1092_vm4, %v1083_v44 }
 0x820   : > { %v1118_v46 = vpop.permute.xlu0 %1117 }
 0x821   : > { %1130 = vst.msk [vmem:[%s1517_s25] sm:$0xff] %vm1129_vm5, %v1118_v46 }
 0x823   : > { %v1120_v47 = vpop.permute.xlu1 %1119 }
 0x824   : > { %1131 = vst.msk [vmem:[%s1517_s25 + $0x8] sm:$0xff] %vm1129_vm5, %v1120_v47  ;;  %v1122_v48 = vpop.permute.xlu0 %1121 }
 0x825   : > { %1132 = vst.msk [vmem:[%s1517_s25 + $0x10] sm:$0xff] %vm1129_vm5, %v1122_v48 }
 0x827   : > { %v1124_v49 = vpop.permute.xlu1 %1123 }
 0x828   : > { %1133 = vst.msk [vmem:[%s1517_s25 + $0x18] sm:$0xff] %vm1129_vm5, %v1124_v49 }
 0x829 PF: > { %s25_s18 = sadd.s32 1, %s1328_s18  }
 0x82a   : > { %p22_p4 = scmp.ge.s32.totalorder %s25_s18, 4  }
 0x82c   :  { %24 = sbr.rel (!%p22_p4) target bundleno = 1 (0x1), region = 110 }

</bundles_post_ra>
